<compile_context>
chip_gen: v7x
topology: tpu7x:2x2x1
jax: 0.10.0
libtpu: 0.0.40
codegen_flags: <defaults>
</compile_context>

<pallas_src>
import functools
import math

import jax
import jax.numpy as jnp
from jax.experimental import pallas as pl
from jax.experimental.pallas import tpu as pltpu


def _ccm_kernel(x_ref, mask_ref, w1_ref, w2_ref, b2_ref, o_ref, *, W, block_b):
    """One grid step: `block_b` images.

    x_ref   : (block_b, Cin, HW)   flattened NCHW input, HW on lanes
    mask_ref: (9*Cin + 1, HW)      per-tap validity mask (last row all ones)
    w1_ref  : (Hid, 9*Cin + 1)     fused 3x3 weights, tap-major; last col = b1
    w2_ref  : (Cout, Hid)          1x1 conv weights (pre-transposed)
    b2_ref  : (Cout, 1)
    o_ref   : (block_b, Cout, HW)  flattened NCHW output (lane-dense store)
    """
    HW = x_ref.shape[2]

    # Hoisted once per grid step (outside the per-image loop): no per-tap /
    # per-image broadcast or zero materialization.
    mask = mask_ref[...]
    w1 = w1_ref[...]
    w2 = w2_ref[...]
    b2 = b2_ref[...]
    ones_row = jnp.ones((1, HW), dtype=x_ref.dtype)
    inv_sqrt2 = jnp.float32(1.0 / math.sqrt(2.0))

    def one_image(b, carry):
        x = x_ref[b]  # (Cin, HW)

        # Stack the 9 lane-rolled taps (+ ones row for the baked-in bias) into
        # a single (9*Cin + 1, HW) RHS; one multiply applies all masks.
        parts = []
        for dy in (-1, 0, 1):
            for dx in (-1, 0, 1):
                shift = dy * W + dx  # patch[p] = x[p + shift] (when in bounds)
                if shift == 0:
                    parts.append(x)
                else:
                    parts.append(pltpu.roll(x, shift=(-shift) % HW, axis=1))
        parts.append(ones_row)
        patch = jnp.concatenate(parts, axis=0) * mask  # (9*Cin + 1, HW)

        # Whole 3x3 conv (+ bias) as ONE MXU matmul, f32 accumulation.
        h = jnp.dot(w1, patch, preferred_element_type=jnp.float32)  # (Hid, HW)

        # Exact GELU (erf formulation), matching PyTorch nn.GELU default.
        h = jnp.float32(0.5) * h * (jnp.float32(1.0) + jax.lax.erf(h * inv_sqrt2))

        # 1x1 conv == channel projection: (Cout, Hid) @ (Hid, HW).
        out = jnp.dot(w2, h, preferred_element_type=jnp.float32) + b2
        o_ref[b] = out.astype(o_ref.dtype)
        return carry

    jax.lax.fori_loop(0, block_b, one_image, None, unroll=True)


def _pick_block_b(B):
    """Images per grid step: amortize step overhead but keep >= 2 grid steps
    (megacore on v7x needs at least two parallel steps)."""
    if B <= 2:
        return 1
    for cand in (8, 4, 2):
        if B % cand == 0 and B // cand >= 2:
            return cand
    return 1


def ccm_forward(x_nchw, w1_hwio, b1, w2_io, b2, *, block_b=None):
    """x_nchw: (B, Cin, H, W). Returns (B, Cout, H, W), matching PyTorch CCM."""
    B, Cin, H, W = x_nchw.shape
    Hid = w1_hwio.shape[3]
    Cout = w2_io.shape[1]
    HW = H * W

    if block_b is None:
        block_b = _pick_block_b(B)
    assert B % block_b == 0
    grid_b = B // block_b

    # Free reshape; no NCHW<->NHWC transpose passes over HBM.
    x_flat = x_nchw.reshape(B, Cin, HW)

    # Fused 3x3 weights: (Hid, 9*Cin), tap-major / channel-minor, + b1 column.
    w1_flat = jnp.transpose(w1_hwio, (3, 0, 1, 2)).reshape(Hid, 9 * Cin)
    w1_fused = jnp.concatenate([w1_flat, b1.reshape(Hid, 1)], axis=1)
    w2_t = jnp.transpose(w2_io, (1, 0))  # (Cout, Hid)
    b2_c = b2.reshape(Cout, 1)

    # Constant per-tap validity mask (same stacking order as the in-kernel
    # patch), with a trailing all-ones row so the bias column survives.
    lane = jnp.arange(HW, dtype=jnp.int32)
    row = lane // W
    col = lane - row * W
    tap_masks = []
    for dy in (-1, 0, 1):
        for dx in (-1, 0, 1):
            ok = jnp.ones((HW,), dtype=jnp.bool_)
            if dy == -1:
                ok = ok & (row >= 1)
            elif dy == 1:
                ok = ok & (row < H - 1)
            if dx == -1:
                ok = ok & (col >= 1)
            elif dx == 1:
                ok = ok & (col < W - 1)
            tap_masks.append(jnp.broadcast_to(ok[None, :], (Cin, HW)))
    mask = jnp.concatenate(
        tap_masks + [jnp.ones((1, HW), dtype=jnp.bool_)], axis=0
    ).astype(x_nchw.dtype)  # (9*Cin + 1, HW)

    kernel = functools.partial(_ccm_kernel, W=W, block_b=block_b)

    out_flat = pl.pallas_call(
        kernel,
        out_shape=jax.ShapeDtypeStruct((B, Cout, HW), x_nchw.dtype),
        grid_spec=pltpu.PrefetchScalarGridSpec(
            num_scalar_prefetch=0,
            grid=(grid_b,),
            in_specs=[
                pl.BlockSpec((block_b, Cin, HW), lambda i: (i, 0, 0)),
                pl.BlockSpec((9 * Cin + 1, HW), lambda i: (0, 0)),
                pl.BlockSpec((Hid, 9 * Cin + 1), lambda i: (0, 0)),
                pl.BlockSpec((Cout, Hid), lambda i: (0, 0)),
                pl.BlockSpec((Cout, 1), lambda i: (0, 0)),
            ],
            out_specs=pl.BlockSpec((block_b, Cout, HW), lambda i: (i, 0, 0)),
        ),
        compiler_params=pltpu.CompilerParams(
            dimension_semantics=("parallel",)),
    )(x_flat, mask, w1_fused, w2_t, b2_c)

    return out_flat.reshape(B, Cout, H, W)


def _reference(x_nchw, w1_hwio, b1, w2_io, b2):
    """Pure-JAX reference (for verification only)."""
    x = jnp.transpose(x_nchw, (0, 2, 3, 1))
    y = jax.lax.conv_general_dilated(
        x, w1_hwio, window_strides=(1, 1), padding="SAME",
        dimension_numbers=("NHWC", "HWIO", "NHWC"))
    y = y + b1
    y = 0.5 * y * (1.0 + jax.lax.erf(y / jnp.sqrt(2.0).astype(y.dtype)))
    y = jnp.einsum("bhwc,cd->bhwd", y, w2_io) + b2
    return jnp.transpose(y, (0, 3, 1, 2))


if __name__ == "__main__":
    # CCM(dim=4, growth_rate=2.0) -> hidden_dim = 8
    B, dim, H, W = 2, 4, 16, 16
    hidden = int(dim * 2.0)

    key = jax.random.PRNGKey(0)
    k_x, k_w1, k_b1, k_w2, k_b2 = jax.random.split(key, 5)

    x = jax.random.normal(k_x, (B, dim, H, W), dtype=jnp.float32)
    # Conv1: PyTorch weight is (hidden, dim, 3, 3); materialized directly in
    # HWIO layout (3, 3, dim, hidden).
    w1 = jax.random.normal(k_w1, (3, 3, dim, hidden), dtype=jnp.float32) * 0.1
    b1 = jax.random.normal(k_b1, (hidden,), dtype=jnp.float32) * 0.1
    # Conv2 (1x1): PyTorch weight (dim, hidden, 1, 1) -> (hidden, dim) matrix.
    w2 = jax.random.normal(k_w2, (hidden, dim), dtype=jnp.float32) * 0.1
    b2 = jax.random.normal(k_b2, (dim,), dtype=jnp.float32) * 0.1

    out = ccm_forward(x, w1, b1, w2, b2)
    out = jax.block_until_ready(out)

    ref = _reference(x, w1, b1, w2, b2)
    assert out.shape == (B, dim, H, W)
    assert jnp.allclose(out, ref, atol=1e-3, rtol=1e-3), (
        float(jnp.max(jnp.abs(out - ref))))

    print("KERNEL_OK")
</pallas_src>

<mosaic_0001>
module attributes {stable_mosaic.version = 11 : i64} {
  func.func @_ccm_kernel(%arg0: i32, %arg1: memref<1x4x256xf32, #tpu.memory_space<vmem>>, %arg2: memref<37x256xf32, #tpu.memory_space<vmem>>, %arg3: memref<8x37xf32, #tpu.memory_space<vmem>>, %arg4: memref<4x8xf32, #tpu.memory_space<vmem>>, %arg5: memref<4x1xf32, #tpu.memory_space<vmem>>, %arg6: memref<1x4x256xf32, #tpu.memory_space<vmem>>) attributes {dimension_semantics = [#tpu.dimension_semantics<parallel>], iteration_bounds = array<i64: 2>, scalar_prefetch = 0 : i64, scratch_operands = 0 : i64, tpu.core_type = #tpu.core_type<tc>, window_params = [{transform_indices = @transform_0, window_bounds = array<i64: 1, 4, 256>}, {pipeline_mode = #tpu.pipeline_mode<synchronous>, transform_indices = @transform_1, window_bounds = array<i64: 37, 256>}, {pipeline_mode = #tpu.pipeline_mode<synchronous>, transform_indices = @transform_2, window_bounds = array<i64: 8, 37>}, {pipeline_mode = #tpu.pipeline_mode<synchronous>, transform_indices = @transform_3, window_bounds = array<i64: 4, 8>}, {pipeline_mode = #tpu.pipeline_mode<synchronous>, transform_indices = @transform_4, window_bounds = array<i64: 4, 1>}, {transform_indices = @transform_5, window_bounds = array<i64: 1, 4, 256>}]} {
    %c0 = arith.constant 0 : index
    %c0_0 = arith.constant 0 : index
    %0 = vector.load %arg2[%c0, %c0_0] : memref<37x256xf32, #tpu.memory_space<vmem>>, vector<37x256xf32>
    %c0_1 = arith.constant 0 : index
    %c0_2 = arith.constant 0 : index
    %1 = vector.load %arg3[%c0_1, %c0_2] : memref<8x37xf32, #tpu.memory_space<vmem>>, vector<8x37xf32>
    %c0_3 = arith.constant 0 : index
    %c0_4 = arith.constant 0 : index
    %2 = vector.load %arg4[%c0_3, %c0_4] : memref<4x8xf32, #tpu.memory_space<vmem>>, vector<4x8xf32>
    %c0_5 = arith.constant 0 : index
    %c0_6 = arith.constant 0 : index
    %3 = vector.load %arg5[%c0_5, %c0_6] : memref<4x1xf32, #tpu.memory_space<vmem>>, vector<4x1xf32>
    %cst = arith.constant 1.000000e+00 : f32
    %4 = vector.broadcast %cst : f32 to vector<1x256xf32>
    %cst_7 = arith.constant 0.707106769 : f32
    %c0_i32 = arith.constant 0 : i32
    %5 = arith.index_cast %c0_i32 : i32 to index
    %c0_8 = arith.constant 0 : index
    %c0_9 = arith.constant 0 : index
    %6 = vector.load %arg1[%5, %c0_8, %c0_9] : memref<1x4x256xf32, #tpu.memory_space<vmem>>, vector<1x4x256xf32>
    %7 = vector.shape_cast %6 : vector<1x4x256xf32> to vector<4x256xf32>
    %c17_i32 = arith.constant 17 : i32
    %8 = tpu.dynamic_rotate %7 by %c17_i32 dim 1 : vector<4x256xf32>, i32 -> vector<4x256xf32>
    %c16_i32 = arith.constant 16 : i32
    %9 = tpu.dynamic_rotate %7 by %c16_i32 dim 1 : vector<4x256xf32>, i32 -> vector<4x256xf32>
    %c15_i32 = arith.constant 15 : i32
    %10 = tpu.dynamic_rotate %7 by %c15_i32 dim 1 : vector<4x256xf32>, i32 -> vector<4x256xf32>
    %c1_i32 = arith.constant 1 : i32
    %11 = tpu.dynamic_rotate %7 by %c1_i32 dim 1 : vector<4x256xf32>, i32 -> vector<4x256xf32>
    %c255_i32 = arith.constant 255 : i32
    %12 = tpu.dynamic_rotate %7 by %c255_i32 dim 1 : vector<4x256xf32>, i32 -> vector<4x256xf32>
    %c241_i32 = arith.constant 241 : i32
    %13 = tpu.dynamic_rotate %7 by %c241_i32 dim 1 : vector<4x256xf32>, i32 -> vector<4x256xf32>
    %c240_i32 = arith.constant 240 : i32
    %14 = tpu.dynamic_rotate %7 by %c240_i32 dim 1 : vector<4x256xf32>, i32 -> vector<4x256xf32>
    %c239_i32 = arith.constant 239 : i32
    %15 = tpu.dynamic_rotate %7 by %c239_i32 dim 1 : vector<4x256xf32>, i32 -> vector<4x256xf32>
    %16 = tpu.concatenate %8, %9, %10, %11, %7, %12, %13, %14, %15, %4 in 0 : vector<4x256xf32>, vector<4x256xf32>, vector<4x256xf32>, vector<4x256xf32>, vector<4x256xf32>, vector<4x256xf32>, vector<4x256xf32>, vector<4x256xf32>, vector<4x256xf32>, vector<1x256xf32> -> vector<37x256xf32>
    %17 = arith.mulf %16, %0 : vector<37x256xf32>
    %cst_10 = arith.constant dense<0.000000e+00> : vector<8x256xf32>
    %18 = tpu.matmul %1, %17, %cst_10 {dimension_numbers = #tpu.dot_dimension_numbers<[1], [0], [0], [1], [0, 0, 1, 1], [], []>} : vector<8x37xf32>, vector<37x256xf32>, vector<8x256xf32> -> vector<8x256xf32>
    %cst_11 = arith.constant 5.000000e-01 : f32
    %19 = vector.broadcast %cst_11 : f32 to vector<8x256xf32>
    %20 = arith.mulf %19, %18 : vector<8x256xf32>
    %21 = vector.broadcast %cst_7 : f32 to vector<8x256xf32>
    %22 = arith.mulf %18, %21 : vector<8x256xf32>
    %23 = math.erf %22 : vector<8x256xf32>
    %cst_12 = arith.constant 1.000000e+00 : f32
    %24 = vector.broadcast %cst_12 : f32 to vector<8x256xf32>
    %25 = arith.addf %24, %23 : vector<8x256xf32>
    %26 = arith.mulf %20, %25 : vector<8x256xf32>
    %cst_13 = arith.constant dense<0.000000e+00> : vector<4x256xf32>
    %27 = tpu.matmul %2, %26, %cst_13 {dimension_numbers = #tpu.dot_dimension_numbers<[1], [0], [0], [1], [0, 0, 1, 1], [], []>} : vector<4x8xf32>, vector<8x256xf32>, vector<4x256xf32> -> vector<4x256xf32>
    %28 = vector.broadcast %3 : vector<4x1xf32> to vector<4x256xf32>
    %29 = arith.addf %27, %28 : vector<4x256xf32>
    %30 = arith.index_cast %c0_i32 : i32 to index
    %c0_14 = arith.constant 0 : index
    %c0_15 = arith.constant 0 : index
    %31 = vector.load %arg6[%30, %c0_14, %c0_15] : memref<1x4x256xf32, #tpu.memory_space<vmem>>, vector<1x4x256xf32>
    %32 = vector.shape_cast %31 : vector<1x4x256xf32> to vector<4x256xf32>
    %33 = vector.shape_cast %29 : vector<4x256xf32> to vector<1x4x256xf32>
    tpu.vector_store %arg6[%30, %c0_14, %c0_15], %33 {strides = array<i32>} : memref<1x4x256xf32, #tpu.memory_space<vmem>>, vector<1x4x256xf32>,
    %c1_i32_16 = arith.constant 1 : i32
    return
  }
  func.func @transform_0(%arg0: i32) -> (i32, i32, i32) {
    %c0_i32 = arith.constant 0 : i32
    %c0_i32_0 = arith.constant 0 : i32
    %c0_i32_1 = arith.constant 0 : i32
    return %arg0, %c0_i32, %c0_i32_0 : i32, i32, i32
  }
  func.func @transform_1(%arg0: i32) -> (i32, i32) {
    %c0_i32 = arith.constant 0 : i32
    %c0_i32_0 = arith.constant 0 : i32
    %c0_i32_1 = arith.constant 0 : i32
    return %c0_i32, %c0_i32_0 : i32, i32
  }
  func.func @transform_2(%arg0: i32) -> (i32, i32) {
    %c0_i32 = arith.constant 0 : i32
    %c0_i32_0 = arith.constant 0 : i32
    %c0_i32_1 = arith.constant 0 : i32
    return %c0_i32, %c0_i32_0 : i32, i32
  }
  func.func @transform_3(%arg0: i32) -> (i32, i32) {
    %c0_i32 = arith.constant 0 : i32
    %c0_i32_0 = arith.constant 0 : i32
    %c0_i32_1 = arith.constant 0 : i32
    return %c0_i32, %c0_i32_0 : i32, i32
  }
  func.func @transform_4(%arg0: i32) -> (i32, i32) {
    %c0_i32 = arith.constant 0 : i32
    %c0_i32_0 = arith.constant 0 : i32
    %c0_i32_1 = arith.constant 0 : i32
    return %c0_i32, %c0_i32_0 : i32, i32
  }
  func.func @transform_5(%arg0: i32) -> (i32, i32, i32) {
    %c0_i32 = arith.constant 0 : i32
    %c0_i32_0 = arith.constant 0 : i32
    %c0_i32_1 = arith.constant 0 : i32
    return %arg0, %c0_i32, %c0_i32_0 : i32, i32, i32
  }
}

</mosaic_0001>

<bundles_post_ra>
// kernel: tpu_custom_call.1
= control target key start
LH: loop header
LB: loop body
LE: loop exit
PB: predicated region body
PF: predicated region fallthrough
CT: control target
= control target key end

     0   :  { %10 = vsyncpa [#allocation3], 0  ;;  %s1181_s0 = inlined_call_operand.hbm [shape: f32[2,4,256], index: 0, kind: input, shape index: {}]   ;;  %s1182_s1 = inlined_call_operand.hbm [shape: f32[37,256], index: 1, kind: input, shape index: {}]   ;;  %s1183_s2 = inlined_call_operand.vmem [shape: f32[8,37], index: 2, kind: input, shape index: {}]   ;;  %s1184_s3 = inlined_call_operand.vmem [shape: f32[4,8], index: 3, kind: input, shape index: {}]   ;;  %s1185_s4 = inlined_call_operand.vmem [shape: f32[4,1], index: 4, kind: input, shape index: {}]   ;;  %s1186_s5 = inlined_call_operand.hbm [shape: f32[2,4,256], index: 5, kind: output, shape index: {}]  }
   0x1   :  { %12 = vsyncpa [#allocation3 + $0x1], 0 }
   0x2   :  { %13 = vsyncpa [#allocation6], 0 }
   0x3   :  { %14 = vsyncpa [#allocation4], 0 }
   0x4   :  { %16 = vsyncpa [#allocation4 + $0x1], 0  ;;  %s928_s18 = smov 0   ;;  %s930_s19 = smov 0  }
   0x5   :  { %s932_s20 = smov 0   ;;  %s934_s21 = smov 0  }
   0x6 LB: > { %s949_s22 = sadd.s32 4294967295, %s881_s21   ;;  %s648_s23 = sadd.s32 4294967294, %s881_s21   ;;  %s881_s21 = sphi %s934_s21, %s1206_s21   ;;  %s877_s20 = sphi %s932_s20, %s1205_s20   ;;  %s873_s19 = sphi %s930_s19, %s1204_s19   ;;  %s869_s18 = sphi %s928_s18, %s1203_s18  }
   0x7   : > { %p42_p0 = scmp.ne.s32.totalorder %s873_s19, %s869_s18  ;;  %p1187_p1 = scmp.eq.s32.totalorder %s949_s22, 0 }
   0x8   : > { %p156_p3 = scmp.eq.s32.totalorder %s648_s23, 1  ;;  %p649_p5 = scmp.ge.s32.totalorder %s881_s21, 1 }
   0x9   : > { %p958_p4 = por %p1187_p1, %p42_p0  ;;  %p163_p7 = scmp.lt.s32.totalorder %s881_s21, 3 }
   0xa   : > { %p963_p6 = por %p156_p3, %p42_p0  ;;  %s883_s27 = smov [#allocation5]  }
   0xb   : > { %s1190_s24 = scalar_select %p958_p4, 1, 0 }
   0xc   : > { %s1191_s25 = scalar_select %p963_p6, 1, 0 }
   0xd   : > { %p968_p8 = pnand %p649_p5, %p163_p7  ;;  %s175_s28 = sshll.u32 %s883_s27, 4  ;;  %s972_s28 = int_to_ptr.vmem [resolvable:$true] %s175_s28 }
   0xe   : > { %s984_s30 = sadd.s32 1, %s881_s21   ;;  %s29_s6 = sadd.s32 1, %s877_s20 }
   0xf   : > { %s1192_s26 = scalar_select %p968_p8, 1, 0 }
  0x10   : > { %p686_p9 = pneg %p968_p8  ;;  %s26_s7 = ssub.s32 %s881_s21, %s984_s30 }
  0x11   : > { %s753_s10 = scalar_lea.hbm %s1182_s1, 1280 }
  0x12   : > { %p979_p11 = pnand %p686_p9, %p1187_p1  ;;  %p754_p12 = scmp.ne.s32.totalorder %s1182_s1, %s753_s10 }
  0x13   : > { %p760_p5 = scmp.lt.u32.totalorder %s753_s10, %s1182_s1 }
  0x14   : > { %p755_p13 = pneg %p979_p11 }
  0x16   : > { %p756_p0 = pnand %p755_p13, %p754_p12 }
  0x18   : > { %p757_p3 = pneg %p756_p0 }
  0x1a   : > { %p762_p7 = pnand %p760_p5, %p757_p3 }
  0x1c   : > { %765 = shalt.err (!%p762_p7)
}
  0x1d   : > { %s766_s15 = scalar_lea.vmem %s972_s28, 1280  ;;  %p774_p2 = scmp.lt.s32.totalorder %s972_s28, %s972_s28 }
  0x1e   : > { %p767_p9 = scmp.ne.s32.totalorder %s972_s28, %s766_s15  ;;  %p775_p6 = scmp.lt.s32.totalorder %s766_s15, %s766_s15 }
  0x20   : > { %p769_p10 = pnand %p767_p9, %p755_p13  ;;  %p776_p4 = por %p775_p6, %p774_p2 }
  0x22   : > { %p770_p1 = pneg %p769_p10 }
  0x24   : > { %p777_p8 = pnand %p776_p4, %p770_p1 }
  0x26   : > { %780 = shalt.err (!%p777_p8)
}
  0x27   : > { %s884_s16 = smov 256   ;;  %s885_s17 = smov 16  }
  0x28   : > { %689 = dma.hbm_to_vmem [thread:$0]  (!%p979_p11), %s1182_s1, 1280, %s972_s28, [#allocation6], %s884_s16, %s884_s16, %s885_s17  }
  0x29   : > { %p27_p2 = scmp.eq.s32.totalorder %s26_s7, 0  ;;  %p36_p1 = scmp.ne.s32.totalorder %s877_s20, %s873_s19 }
  0x2a   : > { %p37_p4 = scmp.eq.s32.totalorder %s881_s21, 0  ;;  %p699_p6 = scmp.lt.s32.totalorder %s881_s21, 2 }
  0x2b   : > { %s1015_s8 = scalar_select %p27_p2, %s877_s20, %s29_s6  }
  0x2c   : > { %p38_p8 = por %p37_p4, %p36_p1  ;;  %p1194_p10 = scmp.eq.s32.totalorder %s949_s22, 1 }
  0x2d   : > { %s198_s10 = sand.u32 1, %s877_s20   ;;  %s668_s11 = sshll.u32 %s881_s21, 7 }
  0x2e   : > { %p1019_p12 = por %p1194_p10, %p36_p1  ;;  %s652_s12 = sshll.u32 %s198_s10, 3 }
  0x2f   : > { %s1028_s14 = scalar_lea.hbm %s1181_s0, %s668_s11  ;;  %s202_s28 = scalar_lea.vmem [#allocation2], %s652_s12 }
  0x30   : > { %s210_s6 = sshll.u32 %s202_s28, 4  ;;  %p1030_p11 = pnand %p699_p6, %p38_p8  ;;  %s1034_s6 = int_to_ptr.vmem [resolvable:$true] %s210_s6 }
  0x31   : > { %s199_s15 = scalar_lea.sflag [#allocation3], %s198_s10  ;;  %s781_s16 = scalar_lea.hbm %s1028_s14, 128 }
  0x32   : > { %p782_p13 = scmp.ne.s32.totalorder %s1028_s14, %s781_s16  ;;  %p783_p0 = pneg %p1030_p11 }
  0x33   : > { %s786_s27 = scalar_lea.hbm %s1181_s0, 256  ;;  %p787_p7 = scmp.lt.u32.totalorder %s1028_s14, %s1181_s0 }
  0x34   : > { %p784_p3 = pnand %p783_p0, %p782_p13  ;;  %p788_p9 = scmp.lt.u32.totalorder %s786_s27, %s781_s16 }
  0x35   : > { %p790_p1 = scmp.lt.u32.totalorder %s781_s16, %s1028_s14 }
  0x36   : > { %p785_p5 = pneg %p784_p3  ;;  %p789_p2 = por %p788_p9, %p787_p7 }
  0x38   : > { %p791_p4 = por %p790_p1, %p789_p2 }
  0x3a   : > { %p792_p6 = pnand %p791_p4, %p785_p5 }
  0x3c   : > { %795 = shalt.err (!%p792_p6)
}
  0x3d   : > { %s796_s10 = scalar_lea.vmem %s1034_s6, 128  ;;  %s886_s29 = smov [#allocation2]  }
  0x3e   : > { %p797_p8 = scmp.ne.s32.totalorder %s1034_s6, %s796_s10  ;;  %s801_s13 = sshll.u32 %s886_s29, 4  ;;  %s802_s13 = int_to_ptr.vmem [resolvable:$false] %s801_s13 }
  0x3f   : > { %s803_s28 = scalar_lea.vmem %s802_s13, 256  ;;  %p804_p3 = scmp.lt.s32.totalorder %s1034_s6, %s802_s13 }
  0x40   : > { %p799_p10 = pnand %p797_p8, %p783_p0  ;;  %p805_p7 = scmp.lt.s32.totalorder %s803_s28, %s796_s10 }
  0x42   : > { %p800_p13 = pneg %p799_p10  ;;  %p806_p9 = por %p805_p7, %p804_p3 }
  0x44   : > { %p807_p2 = pnand %p806_p9, %p800_p13 }
  0x46   : > { %810 = shalt.err (!%p807_p2)
}
  0x47   : > { %693 = dma.hbm_to_vmem [thread:$0]  (!%p1030_p11), %s1028_s14, 128, %s1034_s6, %s199_s15  }
  0x48   : > { %p1197_p5 = scmp.ne.s32.totalorder %s1192_s26, 0 }
  0x49   : > { %s1064_s16 = sand.u32 (!%p1197_p5), 1, %s873_s19   ;;  %p1198_p0 = scmp.ne.s32.totalorder (!%p1197_p5), %s1190_s24, 0 }
  0x4a   : > { %219 = sbr.rel (%p1197_p5) target bundleno = 700 (0x2bc), region = 40  ;;  %s656_s17 = sshll.u32 (!%p1197_p5), %s1064_s16, 3 }
  0x4b   : > { %s222_s23 = scalar_lea.sflag (!%p1197_p5), [#allocation3], %s1064_s16  ;;  %s225_s27 = scalar_lea.vmem (!%p1197_p5), [#allocation2], %s656_s17 }
  0x51   : > { %856 = dma.done.wait (%p1198_p0), %s222_s23, 128  }
  0x52   : > { %858 = vsyncadd (%p1198_p0), %s222_s23, 4294967168  ;;  %p1199_p11 = scmp.eq.s32.totalorder %s949_s22, 0 }
  0x54   : > { %860 = dma.done.wait (%p1199_p11), [#allocation6], 1280   ;;  %p1200_p1 = pmov %p1199_p11 }
  0x55   : > { %v1078_v0 = vld [vmem:[%s225_s27] sm:$0xff]  ;;  %s887_s26 = smov 1   ;;  %s888_s14 = smov 16   ;;  %v893_v2 = vmov 0.0   ;;  %v277_v3 = vlaneseq  ;;  %vm355_vm3 = vcmask 1043456   ;;  %v257_v19 = vld [vmem:[#allocation5 + $0x8] sm:$0xff] }
  0x56   : > { %862 = vsyncadd (%p1200_p1), [#allocation6], 4294966016  ;;  %296 = vrot.lane.b32.xlu1 %v1078_v0, %s887_s26  ;;  %282 = vrot.lane.b32.xlu0 %v1078_v0, %s888_s14  ;;  %v1084_v1 = vcombine.high %v1078_v0, %v1078_v0  ;;  %s889_s24 = smov 17   ;;  %s890_s6 = smov 15   ;;  %v259_v24 = vld [vmem:[#allocation5 + $0x18] sm:$0xff]  ;;  %v256_v26 = vld [vmem:[#allocation5] sm:$0xff] }
  0x57   : > { %s891_s7 = smov 127   ;;  %s892_s15 = smov 112   ;;  %451 = vmatprep.mubr.f32.mxu0 %v893_v2  ;;  %541 = vmatprep.mubr.f32.mxu1 %v893_v2  ;;  %v1100_v6 = vand.u32 127, %v277_v3  ;;  %v258_v27 = vld [vmem:[#allocation5 + $0x10] sm:$0xff]  ;;  %v261_v49 = vld [vmem:[#allocation5 + $0x28] sm:$0xff]  ;;  %v263_v57 = vld [vmem:[#allocation5 + $0x38] sm:$0xff] }
  0x58   : > { %s894_s11 = smov 113   ;;  %s895_s12 = smov 111   ;;  %v262_v56 = vld [vmem:[#allocation5 + $0x30] sm:$0xff]  ;;  %v260_v58 = vld [vmem:[#allocation5 + $0x20] sm:$0xff]  ;;  %vm380_vm9 = vcmask 1044480   ;;  %vm376_vm10 = vcmask 302080  }
  0x59   : > { %vm300_vm0 = vcmp.lt.s32.totalorder %v1100_v6, 1  ;;  %vm286_vm1 = vcmp.lt.s32.totalorder %v1100_v6, 16  ;;  %vm279_vm2 = vcmp.lt.s32.totalorder %v1100_v6, 17  ;;  %vm293_vm4 = vcmp.lt.s32.totalorder %v1100_v6, 15 }
  0x5a   : > { %273 = vrot.lane.b32.xlu0 %v1078_v0, %s889_s24  ;;  %298 = vrot.lane.b32.xlu1 %v1084_v1, %s887_s26  ;;  %vm307_vm5 = vcmp.lt.s32.totalorder %v1100_v6, 127  ;;  %vm321_vm6 = vcmp.lt.s32.totalorder %v1100_v6, 112  ;;  %vm314_vm7 = vcmp.lt.s32.totalorder %v1100_v6, 113  ;;  %vm328_vm8 = vcmp.lt.s32.totalorder %v1100_v6, 111  ;;  %s669_s26 = sshll.u32 %s949_s22, 7  ;;  %s897_s22 = smov [#allocation7]  }
  0x5b   : > { %vm473_vm11 = vcmask 64512  }
  0x5e   : > { %275 = vrot.lane.b32.xlu1 %v1084_v1, %s889_s24  ;;  %284 = vrot.lane.b32.xlu0 %v1084_v1, %s888_s14  ;;  %s255_s14 = scalar_lea.vmem [#allocation7], %s656_s17  ;;  %s815_s17 = sshll.u32 %s897_s22, 4  ;;  %s816_s17 = int_to_ptr.vmem [resolvable:$false] %s815_s17 }
  0x5f   : > { %s568_s24 = sshll.u32 %s255_s14, 4  ;;  %s817_s10 = scalar_lea.vmem %s816_s17, 256  ;;  %s1139_s24 = int_to_ptr.vmem [resolvable:$true] %s568_s24 }
  0x60   : > { %p818_p10 = scmp.lt.s32.totalorder %s1139_s24, %s816_s17 }
  0x62   : > { %291 = vrot.lane.b32.xlu1 %v1084_v1, %s890_s6  ;;  %289 = vrot.lane.b32.xlu0 %v1078_v0, %s890_s6 }
  0x66   : > { %305 = vrot.lane.b32.xlu1 %v1084_v1, %s891_s7  ;;  %303 = vrot.lane.b32.xlu0 %v1078_v0, %s891_s7 }
  0x6a   : > { %319 = vrot.lane.b32.xlu1 %v1084_v1, %s892_s15  ;;  %317 = vrot.lane.b32.xlu0 %v1078_v0, %s892_s15  ;;  %s1137_s15 = scalar_lea.hbm %s1186_s5, %s669_s26 }
  0x6e   : > { %312 = vrot.lane.b32.xlu1 %v1084_v1, %s894_s11  ;;  %310 = vrot.lane.b32.xlu0 %v1078_v0, %s894_s11  ;;  %s554_s11 = scalar_lea.sflag [#allocation4], %s1064_s16 }
  0x72   : > { %326 = vrot.lane.b32.xlu1 %v1084_v1, %s895_s12  ;;  %324 = vrot.lane.b32.xlu0 %v1078_v0, %s895_s12  ;;  %s811_s12 = scalar_lea.vmem %s1139_s24, 128 }
  0x73   : > { %p812_p4 = scmp.ne.s32.totalorder %s1139_s24, %s811_s12  ;;  %p819_p13 = scmp.lt.s32.totalorder %s817_s10, %s811_s12 }
  0x75   : > { %p813_p6 = pnand %p812_p4, %p1019_p12  ;;  %p820_p3 = por %p819_p13, %p818_p10 }
  0x77   : > { %p814_p8 = pneg %p813_p6 }
  0x79   : > { %p821_p7 = pnand %p820_p3, %p814_p8 }
  0xc8   : > { %v297_v4 = vpop.permute.xlu1 %296  ;;  %v283_v5 = vpop.permute.xlu0 %282 }
  0xcc   : > { %v274_v7 = vpop.permute.xlu0 %273  ;;  %v299_v8 = vpop.permute.xlu1 %298 }
  0xcd   : > { %v301_v11 = vsel %vm300_vm0, %v297_v4, %v299_v8  ;;  %v302_v12 = vsel %vm300_vm0, %v299_v8, %v297_v4 }
  0xce   : > { %v339_v20 = vrot.slane %v302_v12, 4  ;;  %v340_v21 = vrot.slane %v301_v11, 4 }
  0xd0   : > { %v276_v9 = vpop.permute.xlu1 %275  ;;  %v285_v10 = vpop.permute.xlu0 %284 }
  0xd1   : > { %v287_v13 = vsel %vm286_vm1, %v283_v5, %v285_v10  ;;  %v288_v14 = vsel %vm286_vm1, %v285_v10, %v283_v5  ;;  %v280_v17 = vsel %vm279_vm2, %v274_v7, %v276_v9  ;;  %v281_v18 = vsel %vm279_vm2, %v276_v9, %v274_v7  ;;  %v265_v5 = vld [vmem:[#allocation5 + $0x48] sm:$0x1f]  ;;  %v264_v7 = vld [vmem:[#allocation5 + $0x40] sm:$0x1f] }
  0xd2   : > { %v333_v15 = vrot.slane %v288_v14, 4  ;;  %v334_v16 = vrot.slane %v287_v13, 4 }
  0xd4   : > { %v292_v22 = vpop.permute.xlu1 %291  ;;  %v290_v23 = vpop.permute.xlu0 %289  ;;  %v357_v25 = vsel %vm355_vm3, %v280_v17, %v334_v16  ;;  %v356_v28 = vsel %vm355_vm3, %v281_v18, %v333_v15  ;;  %v266_v15 = vld [vmem:[%s1183_s2] sm:$0xff]  ;;  %v896_v17 = vmov 0  }
  0xd5   : > { %v294_v29 = vsel %vm293_vm4, %v290_v23, %v292_v22  ;;  %v295_v30 = vsel %vm293_vm4, %v292_v22, %v290_v23  ;;  %v367_v33 = vmul.f32 %v357_v25, %v257_v19  ;;  %v366_v35 = vmul.f32 %v356_v28, %v256_v26  ;;  %v268_v16 = vld [vmem:[%s1185_s4] sm:$0xf]  ;;  %747 = vset.pattern.permute.xlu0 %v896_v17 }
  0xd6   : > { %v358_v31 = vsel %vm355_vm3, %v295_v30, %v339_v20  ;;  %v359_v32 = vsel %vm355_vm3, %v294_v29, %v340_v21  ;;  %470 = vperm.xlu0 %747, %v268_v16   ;;  %v267_v30 = vld [vmem:[%s1184_s3] sm:$0xf] }
  0xd7   : > { %v369_v34 = vmul.f32 %v359_v32, %v259_v24  ;;  %v368_v36 = vmul.f32 %v358_v31, %v258_v27 }
  0xd8   : > { %v306_v37 = vpop.permute.xlu1 %305  ;;  %v304_v38 = vpop.permute.xlu0 %303 }
  0xd9   : > { %v308_v39 = vsel %vm307_vm5, %v304_v38, %v306_v37  ;;  %v309_v40 = vsel %vm307_vm5, %v306_v37, %v304_v38  ;;  %v670_v41 = vpack.c.bf16 %v369_v34, %v367_v33  ;;  %v672_v42 = vpack.c.bf16 %v368_v36, %v366_v35 }
  0xda   : > { %v345_v43 = vrot.slane %v308_v39, 4  ;;  %v346_v44 = vrot.slane %v309_v40, 4 }
  0xdb   : > { %671 = vmatprep.subr.bf16.mxu0 %v670_v41 }
  0xdc   : > { %v320_v45 = vpop.permute.xlu1 %319  ;;  %v318_v46 = vpop.permute.xlu0 %317  ;;  %673 = vmatpush1.bf16.msra.mxu0 %v672_v42  ;;  %v360_v50 = vsel %vm355_vm3, %v1078_v0, %v345_v43  ;;  %v361_v51 = vsel %vm355_vm3, %v1084_v1, %v346_v44 }
  0xdd   : > { %v322_v47 = vsel %vm321_vm6, %v318_v46, %v320_v45  ;;  %v323_v48 = vsel %vm321_vm6, %v320_v45, %v318_v46  ;;  %v371_v2 = vmul.f32 %v361_v51, %v261_v49  ;;  %v370_v3 = vmul.f32 %v360_v50, %v260_v58 }
  0xde   : > { %v351_v52 = vrot.slane %v322_v47, 4  ;;  %v352_v53 = vrot.slane %v323_v48, 4 }
  0xe0   : > { %v313_v54 = vpop.permute.xlu1 %312  ;;  %v311_v55 = vpop.permute.xlu0 %310 }
  0xe1   : > { %v315_v59 = vsel %vm314_vm7, %v311_v55, %v313_v54  ;;  %v316_v60 = vsel %vm314_vm7, %v313_v54, %v311_v55 }
  0xe2   : > { %v362_v61 = vsel %vm355_vm3, %v315_v59, %v351_v52  ;;  %v363_v62 = vsel %vm355_vm3, %v316_v60, %v352_v53 }
  0xe3   : > { %v372_v63 = vmul.f32 %v362_v61, %v262_v56  ;;  %v373_v0 = vmul.f32 %v363_v62, %v263_v57 }
  0xe4   : > { %v327_v1 = vpop.permute.xlu1 %326  ;;  %v325_v4 = vpop.permute.xlu0 %324 }
  0xe5   : > { %v329_v8 = vsel %vm328_vm8, %v325_v4, %v327_v1  ;;  %v330_v9 = vsel %vm328_vm8, %v327_v1, %v325_v4  ;;  %v674_v10 = vpack.c.bf16 %v373_v0, %v371_v2  ;;  %v676_v11 = vpack.c.bf16 %v372_v63, %v370_v3 }
  0xe6   : > { %v364_v12 = vsel %vm355_vm3, %v329_v8, 1.0  ;;  %v365_v13 = vsel %vm355_vm3, %v330_v9, 1.0 }
  0xe7   : > { %v375_v14 = vmul.f32 %v365_v13, %v265_v5  ;;  %675 = vmatprep.subr.bf16.mxu0 %v674_v10  ;;  %v374_v6 = vmul.f32 %v364_v12, %v264_v7 }
  0xe8   : > { %677 = vmatpush1.bf16.msra.mxu0 %v676_v11 }
  0xe9   : > { %659 = vmatprep.subr.msk.mxu0 %vm380_vm9, %v375_v14 }
  0xec   : > { %660 = vmatpush1.msk.msra.mxu0 %vm380_vm9, %v374_v6 }
  0xed   : > { %661 = vmatmul.mubr.msk.f32.vlgmr.msra.gmra.mrb[0].mxu0 %vm376_vm10, %v266_v15 }
 0x155   : > { %v471_v31 = vpop.permute.xlu0 %470 }
 0x1c0   : > { %v453_v18 = vpop.f32.mrb[0].mxu0 }
 0x1c1   : > { %v460_v19 = vmul.f32 0.70710677, %v453_v18  ;;  %v455_v20 = vpop.f32.mrb[1].mxu0  ;;  %v458_v27 = vmul.f32 0.5, %v453_v18 }
 0x1c2   : > { %v461_v21 = vmul.f32 0.70710677, %v455_v20  ;;  %v459_v25 = vmul.f32 0.5, %v455_v20 }
 0x1c3   : > { %749 = verf.f32 %v460_v19 }
 0x1c4   : > { %751 = verf.f32 %v461_v21 }
 0x1cd   : > { %v750_v22 = vpop.eup %749 }
 0x1ce   : > { %v752_v23 = vpop.eup %751  ;;  %v464_v24 = vadd.f32 1.0, %v750_v22 }
 0x1cf   : > { %v465_v26 = vadd.f32 1.0, %v752_v23 }
 0x1d0   : > { %v466_v29 = vmul.f32 %v464_v24, %v458_v27 }
 0x1d1   : > { %v467_v28 = vmul.f32 %v465_v26, %v459_v25 }
 0x1d3   : > { %477 = vmatprep.subr.mxu1 %v467_v28 }
 0x1d4   : > { %478 = vmatpush1.msra.mxu1 %v466_v29 }
 0x1d5   : > { %662 = vmatmul.mubr.msk.f32.vlgmr.msra.gmra.mrb[0].mxu1 %vm473_vm11, %v267_v30 }
 0x2a8   : > { %v543_v32 = vpop.f32.mrb[0].mxu1 }
 0x2a9   : > { %v544_v33 = vadd.f32 %v543_v32, %v471_v31  ;;  %v545_v34 = vpop.f32.mrb[1].mxu1 }
 0x2aa   : > { %v546_v35 = vadd.f32 %v545_v34, %v471_v31 }
 0x2ac   : > { %v550_v36 = vcombine.low %v544_v33, %v546_v35 }
 0x2ae   : > { %552 = vst [vmem:[%s255_s14] sm:$0xff] %v550_v36 }
 0x2af   : > { %824 = shalt.err (!%p821_p7)
}
 0x2b0   : > { %s825_s16 = scalar_lea.hbm %s1137_s15, 128  ;;  %s829_s28 = scalar_lea.hbm %s1186_s5, 256 }
 0x2b1   : > { %p826_p9 = scmp.ne.s32.totalorder %s1137_s15, %s825_s16  ;;  %p830_p0 = scmp.lt.u32.totalorder %s1137_s15, %s1186_s5 }
 0x2b2   : > { %p831_p11 = scmp.lt.u32.totalorder %s829_s28, %s825_s16  ;;  %p833_p4 = scmp.lt.u32.totalorder %s825_s16, %s1137_s15 }
 0x2b3   : > { %p827_p2 = pnand %p826_p9, %p1019_p12 }
 0x2b4   : > { %p832_p1 = por %p831_p11, %p830_p0 }
 0x2b5   : > { %p828_p5 = pneg %p827_p2 }
 0x2b6   : > { %p834_p6 = por %p833_p4, %p832_p1 }
 0x2b8   : > { %p835_p8 = pnand %p834_p6, %p828_p5 }
 0x2ba   : > { %838 = shalt.err (!%p835_p8)
}
 0x2bb   : > { %684 = dma.vmem_to_hbm [thread:$0]  (%p1019_p12), %s1139_s24, 128, %s1137_s15, %s554_s11  }
 0x2bc PF: > { %s580_s26 = sand.u32 1, %s869_s18   ;;  %p1201_p10 = scmp.ne.s32.totalorder %s1191_s25, 0 }
 0x2bd   : > { %p1202_p13 = scmp.ge.s32.totalorder %s881_s21, 2  ;;  %s581_s14 = scalar_lea.sflag [#allocation4], %s580_s26 }
 0x2bf   : > { %p695_p3 = pnand %p1202_p13, %p1201_p10 }
 0x2c1   : > { %864 = dma.done.wait (!%p695_p3), %s581_s14, 128  }
 0x2c2   : > { %866 = vsyncadd (!%p695_p3), %s581_s14, 4294967168  ;;  %p19_p7 = scmp.ge.s32.totalorder %s984_s30, 4   ;;  %s1203_s18 = smov %s873_s19 }
 0x2c3   : > { %s1204_s19 = smov %s877_s20  ;;  %s1205_s20 = smov %s1015_s8 }
 0x2c4   : > { %s1206_s21 = smov %s984_s30  ;;  %21 = sbr.rel (!%p19_p7) target bundleno = 6 (0x6), region = 89 }
 0x2cb   :  { %586 = vsyncpa [#allocation3], 1 }
 0x2cc   :  { %588 = vsyncpa [#allocation3 + $0x1], 1 }
 0x2cd   :  { %589 = vsyncpa [#allocation6], 1 }
 0x2ce   :  { %590 = vsyncpa [#allocation4], 1 }
 0x2cf   :  { %592 = vsyncpa [#allocation4 + $0x1], 1 }

</bundles_post_ra>
